<compile_context>
chip_gen: v7x
topology: tpu7x:2x2x1
jax: 0.10.0
libtpu: 0.0.40
codegen_flags: <defaults>
</compile_context>

<pallas_src>
import jax
import jax.numpy as jnp
from jax.experimental import pallas as pl
from jax.experimental.pallas import tpu as pltpu


def qnet_kernel(x_ref,
                w1_ref, b1_ref,
                w2_ref, b2_ref,
                w3_ref, b3_ref,
                w4_ref, b4_ref,
                o_ref):
    # x_ref: (TB, 11) f32; w1/w2/w3: bf16; biases + w4 (as a (1, 256) row): f32.
    x = x_ref[...]

    h = jnp.dot(x.astype(jnp.bfloat16), w1_ref[...],
                preferred_element_type=jnp.float32) + b1_ref[...]
    h = jnp.maximum(h, 0.0)

    h = jnp.dot(h.astype(jnp.bfloat16), w2_ref[...],
                preferred_element_type=jnp.float32) + b2_ref[...]
    h = jnp.maximum(h, 0.0)

    h = jnp.dot(h.astype(jnp.bfloat16), w3_ref[...],
                preferred_element_type=jnp.float32) + b3_ref[...]
    h = jnp.maximum(h, 0.0)

    # Final 256 -> 1 layer: VPU multiply + lane reduce (avoids an N=1 MXU pass).
    out = jnp.sum(h * w4_ref[...], axis=-1, keepdims=True) + b4_ref[...]
    o_ref[...] = out.astype(o_ref.dtype)


def _round_up(x, m):
    return (x + m - 1) // m * m


def qnet_forward(state, params, *, block_b=512):
    """state: (B, 11) float32 -> (B, 1) float32."""
    B = state.shape[0]
    w1, b1, w2, b2, w3, b3, w4, b4 = params

    # bf16 weights for the MXU layers; final layer kept f32 for the VPU reduce.
    w1b = w1.astype(jnp.bfloat16)
    w2b = w2.astype(jnp.bfloat16)
    w3b = w3.astype(jnp.bfloat16)
    w4t = w4.reshape(1, -1)  # (1, 256), f32

    # Batch tile: multiple of 8 (f32 sublane), capped at block_b; pad B up to a tile multiple.
    TB = min(block_b, _round_up(B, 8))
    Bp = _round_up(B, TB)
    x = state if Bp == B else jnp.pad(state, ((0, Bp - B), (0, 0)))
    nb = Bp // TB

    def full(a):
        return pl.BlockSpec(a.shape, lambda i: (0,) * a.ndim)

    out = pl.pallas_call(
        qnet_kernel,
        out_shape=jax.ShapeDtypeStruct((Bp, 1), jnp.float32),
        grid=(nb,),
        in_specs=[pl.BlockSpec((TB, 11), lambda i: (i, 0)),
                  full(w1b), full(b1),
                  full(w2b), full(b2),
                  full(w3b), full(b3),
                  full(w4t), full(b4)],
        out_specs=pl.BlockSpec((TB, 1), lambda i: (i, 0)),
        compiler_params=pltpu.CompilerParams(
            dimension_semantics=("parallel",)),
    )(x, w1b, b1, w2b, b2, w3b, b3, w4t, b4)

    return out[:B]


def init_params(key):
    """Deterministic init mimicking PyTorch's nn.Linear default (uniform +-1/sqrt(fan_in)).
    Weights stored as (in_features, out_features); biases as (1, out_features)."""
    dims = [(11, 128), (128, 256), (256, 256), (256, 1)]
    params = []
    for (fan_in, fan_out) in dims:
        key, kw, kb = jax.random.split(key, 3)
        bound = 1.0 / (fan_in ** 0.5)
        w = jax.random.uniform(kw, (fan_in, fan_out), jnp.float32, -bound, bound)
        b = jax.random.uniform(kb, (1, fan_out), jnp.float32, -bound, bound)
        params += [w, b]
    return tuple(params)


def qnet_reference(state, params):
    """Pure-JAX reference with the same bf16 quantization as the kernel."""
    w1, b1, w2, b2, w3, b3, w4, b4 = params
    bf = jnp.bfloat16
    h = jnp.maximum(jnp.dot(state.astype(bf), w1.astype(bf),
                            preferred_element_type=jnp.float32) + b1, 0.0)
    h = jnp.maximum(jnp.dot(h.astype(bf), w2.astype(bf),
                            preferred_element_type=jnp.float32) + b2, 0.0)
    h = jnp.maximum(jnp.dot(h.astype(bf), w3.astype(bf),
                            preferred_element_type=jnp.float32) + b3, 0.0)
    return jnp.sum(h * w4.reshape(1, -1), axis=-1, keepdims=True) + b4


if __name__ == "__main__":
    key = jax.random.PRNGKey(0)
    key, kx = jax.random.split(key)

    B = 8  # small batch (kernel also supports large / ragged B via the batch grid + padding)
    state = jax.random.normal(kx, (B, 11), jnp.float32)
    params = init_params(key)

    out = jax.block_until_ready(qnet_forward(state, params))

    ref = qnet_reference(state, params)
    assert out.shape == (B, 1), out.shape
    assert jnp.allclose(out, ref, atol=1e-2, rtol=1e-2), "mismatch vs reference"

    print("KERNEL_OK")
</pallas_src>

<mosaic_0001>
module attributes {stable_mosaic.version = 11 : i64} {
  func.func @qnet_kernel(%arg0: i32, %arg1: memref<8x11xf32, #tpu.memory_space<vmem>>, %arg2: memref<11x128xbf16, #tpu.memory_space<vmem>>, %arg3: memref<1x128xf32, #tpu.memory_space<vmem>>, %arg4: memref<128x256xbf16, #tpu.memory_space<vmem>>, %arg5: memref<1x256xf32, #tpu.memory_space<vmem>>, %arg6: memref<256x256xbf16, #tpu.memory_space<vmem>>, %arg7: memref<1x256xf32, #tpu.memory_space<vmem>>, %arg8: memref<1x256xf32, #tpu.memory_space<vmem>>, %arg9: memref<1x1xf32, #tpu.memory_space<vmem>>, %arg10: memref<8x1xf32, #tpu.memory_space<vmem>>) attributes {dimension_semantics = [#tpu.dimension_semantics<parallel>], iteration_bounds = array<i64: 1>, scalar_prefetch = 0 : i64, scratch_operands = 0 : i64, tpu.core_type = #tpu.core_type<tc>, window_params = [{transform_indices = @transform_0, window_bounds = array<i64: 8, 11>}, {pipeline_mode = #tpu.pipeline_mode<synchronous>, transform_indices = @transform_1, window_bounds = array<i64: 11, 128>}, {pipeline_mode = #tpu.pipeline_mode<synchronous>, transform_indices = @transform_2, window_bounds = array<i64: 1, 128>}, {pipeline_mode = #tpu.pipeline_mode<synchronous>, transform_indices = @transform_3, window_bounds = array<i64: 128, 256>}, {pipeline_mode = #tpu.pipeline_mode<synchronous>, transform_indices = @transform_4, window_bounds = array<i64: 1, 256>}, {pipeline_mode = #tpu.pipeline_mode<synchronous>, transform_indices = @transform_5, window_bounds = array<i64: 256, 256>}, {pipeline_mode = #tpu.pipeline_mode<synchronous>, transform_indices = @transform_6, window_bounds = array<i64: 1, 256>}, {pipeline_mode = #tpu.pipeline_mode<synchronous>, transform_indices = @transform_7, window_bounds = array<i64: 1, 256>}, {pipeline_mode = #tpu.pipeline_mode<synchronous>, transform_indices = @transform_8, window_bounds = array<i64: 1, 1>}, {transform_indices = @transform_9, window_bounds = array<i64: 8, 1>}]} {
    %c0 = arith.constant 0 : index
    %c0_0 = arith.constant 0 : index
    %0 = vector.load %arg1[%c0, %c0_0] : memref<8x11xf32, #tpu.memory_space<vmem>>, vector<8x11xf32>
    %1 = arith.truncf %0 : vector<8x11xf32> to vector<8x11xbf16>
    %c0_1 = arith.constant 0 : index
    %c0_2 = arith.constant 0 : index
    %2 = vector.load %arg2[%c0_1, %c0_2] : memref<11x128xbf16, #tpu.memory_space<vmem>>, vector<11x128xbf16>
    %cst = arith.constant dense<0.000000e+00> : vector<8x128xf32>
    %3 = tpu.matmul %1, %2, %cst {dimension_numbers = #tpu.dot_dimension_numbers<[1], [0], [0], [1], [0, 0, 1, 1], [], []>} : vector<8x11xbf16>, vector<11x128xbf16>, vector<8x128xf32> -> vector<8x128xf32>
    %c0_3 = arith.constant 0 : index
    %c0_4 = arith.constant 0 : index
    %4 = vector.load %arg3[%c0_3, %c0_4] : memref<1x128xf32, #tpu.memory_space<vmem>>, vector<1x128xf32>
    %5 = vector.broadcast %4 : vector<1x128xf32> to vector<8x128xf32>
    %6 = arith.addf %3, %5 : vector<8x128xf32>
    %cst_5 = arith.constant 0.000000e+00 : f32
    %7 = vector.broadcast %cst_5 : f32 to vector<8x128xf32>
    %8 = arith.maximumf %6, %7 : vector<8x128xf32>
    %9 = arith.truncf %8 : vector<8x128xf32> to vector<8x128xbf16>
    %c0_6 = arith.constant 0 : index
    %c0_7 = arith.constant 0 : index
    %10 = vector.load %arg4[%c0_6, %c0_7] : memref<128x256xbf16, #tpu.memory_space<vmem>>, vector<128x256xbf16>
    %cst_8 = arith.constant dense<0.000000e+00> : vector<8x256xf32>
    %11 = tpu.matmul %9, %10, %cst_8 {dimension_numbers = #tpu.dot_dimension_numbers<[1], [0], [0], [1], [0, 0, 1, 1], [], []>} : vector<8x128xbf16>, vector<128x256xbf16>, vector<8x256xf32> -> vector<8x256xf32>
    %c0_9 = arith.constant 0 : index
    %c0_10 = arith.constant 0 : index
    %12 = vector.load %arg5[%c0_9, %c0_10] : memref<1x256xf32, #tpu.memory_space<vmem>>, vector<1x256xf32>
    %13 = vector.broadcast %12 : vector<1x256xf32> to vector<8x256xf32>
    %14 = arith.addf %11, %13 : vector<8x256xf32>
    %cst_11 = arith.constant 0.000000e+00 : f32
    %15 = vector.broadcast %cst_11 : f32 to vector<8x256xf32>
    %16 = arith.maximumf %14, %15 : vector<8x256xf32>
    %17 = arith.truncf %16 : vector<8x256xf32> to vector<8x256xbf16>
    %c0_12 = arith.constant 0 : index
    %c0_13 = arith.constant 0 : index
    %18 = vector.load %arg6[%c0_12, %c0_13] : memref<256x256xbf16, #tpu.memory_space<vmem>>, vector<256x256xbf16>
    %cst_14 = arith.constant dense<0.000000e+00> : vector<8x256xf32>
    %19 = tpu.matmul %17, %18, %cst_14 {dimension_numbers = #tpu.dot_dimension_numbers<[1], [0], [0], [1], [0, 0, 1, 1], [], []>} : vector<8x256xbf16>, vector<256x256xbf16>, vector<8x256xf32> -> vector<8x256xf32>
    %c0_15 = arith.constant 0 : index
    %c0_16 = arith.constant 0 : index
    %20 = vector.load %arg7[%c0_15, %c0_16] : memref<1x256xf32, #tpu.memory_space<vmem>>, vector<1x256xf32>
    %21 = vector.broadcast %20 : vector<1x256xf32> to vector<8x256xf32>
    %22 = arith.addf %19, %21 : vector<8x256xf32>
    %cst_17 = arith.constant 0.000000e+00 : f32
    %23 = vector.broadcast %cst_17 : f32 to vector<8x256xf32>
    %24 = arith.maximumf %22, %23 : vector<8x256xf32>
    %c0_18 = arith.constant 0 : index
    %c0_19 = arith.constant 0 : index
    %25 = vector.load %arg8[%c0_18, %c0_19] : memref<1x256xf32, #tpu.memory_space<vmem>>, vector<1x256xf32>
    %26 = vector.broadcast %25 : vector<1x256xf32> to vector<8x256xf32>
    %27 = arith.mulf %24, %26 : vector<8x256xf32>
    %cst_20 = arith.constant dense<0.000000e+00> : vector<8xf32>
    %28 = vector.multi_reduction <add>, %27, %cst_20 [1] : vector<8x256xf32> to vector<8xf32>
    %29 = vector.shape_cast %28 : vector<8xf32> to vector<8x1xf32>
    %c0_21 = arith.constant 0 : index
    %c0_22 = arith.constant 0 : index
    %30 = vector.load %arg9[%c0_21, %c0_22] : memref<1x1xf32, #tpu.memory_space<vmem>>, vector<1x1xf32>
    %31 = vector.broadcast %30 : vector<1x1xf32> to vector<8x1xf32>
    %32 = arith.addf %29, %31 : vector<8x1xf32>
    %c0_23 = arith.constant 0 : index
    %c0_24 = arith.constant 0 : index
    %33 = vector.load %arg10[%c0_23, %c0_24] : memref<8x1xf32, #tpu.memory_space<vmem>>, vector<8x1xf32>
    tpu.vector_store %arg10[%c0_23, %c0_24], %32 {strides = array<i32>} : memref<8x1xf32, #tpu.memory_space<vmem>>, vector<8x1xf32>,
    return
  }
  func.func @transform_0(%arg0: i32) -> (i32, i32) {
    %c0_i32 = arith.constant 0 : i32
    %c0_i32_0 = arith.constant 0 : i32
    return %arg0, %c0_i32 : i32, i32
  }
  func.func @transform_1(%arg0: i32) -> (i32, i32) {
    %c0_i32 = arith.constant 0 : i32
    %c0_i32_0 = arith.constant 0 : i32
    %c0_i32_1 = arith.constant 0 : i32
    return %c0_i32, %c0_i32_0 : i32, i32
  }
  func.func @transform_2(%arg0: i32) -> (i32, i32) {
    %c0_i32 = arith.constant 0 : i32
    %c0_i32_0 = arith.constant 0 : i32
    %c0_i32_1 = arith.constant 0 : i32
    return %c0_i32, %c0_i32_0 : i32, i32
  }
  func.func @transform_3(%arg0: i32) -> (i32, i32) {
    %c0_i32 = arith.constant 0 : i32
    %c0_i32_0 = arith.constant 0 : i32
    %c0_i32_1 = arith.constant 0 : i32
    return %c0_i32, %c0_i32_0 : i32, i32
  }
  func.func @transform_4(%arg0: i32) -> (i32, i32) {
    %c0_i32 = arith.constant 0 : i32
    %c0_i32_0 = arith.constant 0 : i32
    %c0_i32_1 = arith.constant 0 : i32
    return %c0_i32, %c0_i32_0 : i32, i32
  }
  func.func @transform_5(%arg0: i32) -> (i32, i32) {
    %c0_i32 = arith.constant 0 : i32
    %c0_i32_0 = arith.constant 0 : i32
    %c0_i32_1 = arith.constant 0 : i32
    return %c0_i32, %c0_i32_0 : i32, i32
  }
  func.func @transform_6(%arg0: i32) -> (i32, i32) {
    %c0_i32 = arith.constant 0 : i32
    %c0_i32_0 = arith.constant 0 : i32
    %c0_i32_1 = arith.constant 0 : i32
    return %c0_i32, %c0_i32_0 : i32, i32
  }
  func.func @transform_7(%arg0: i32) -> (i32, i32) {
    %c0_i32 = arith.constant 0 : i32
    %c0_i32_0 = arith.constant 0 : i32
    %c0_i32_1 = arith.constant 0 : i32
    return %c0_i32, %c0_i32_0 : i32, i32
  }
  func.func @transform_8(%arg0: i32) -> (i32, i32) {
    %c0_i32 = arith.constant 0 : i32
    %c0_i32_0 = arith.constant 0 : i32
    %c0_i32_1 = arith.constant 0 : i32
    return %c0_i32, %c0_i32_0 : i32, i32
  }
  func.func @transform_9(%arg0: i32) -> (i32, i32) {
    %c0_i32 = arith.constant 0 : i32
    %c0_i32_0 = arith.constant 0 : i32
    return %arg0, %c0_i32 : i32, i32
  }
}

</mosaic_0001>

<bundles_post_ra>
// kernel: tpu_custom_call.1
= control target key start
LH: loop header
LB: loop body
LE: loop exit
PB: predicated region body
PF: predicated region fallthrough
CT: control target
= control target key end

     0   :  { %s958_s0 = inlined_call_operand.hbm [shape: f32[8,11], index: 0, kind: input, shape index: {}]   ;;  %s959_s1 = inlined_call_operand.hbm [shape: bf16[11,128], index: 1, kind: input, shape index: {}]   ;;  %s960_s2 = inlined_call_operand.vmem [shape: f32[1,128], index: 2, kind: input, shape index: {}]   ;;  %s961_s3 = inlined_call_operand.hbm [shape: bf16[128,256], index: 3, kind: input, shape index: {}]   ;;  %s962_s4 = inlined_call_operand.vmem [shape: f32[1,256], index: 4, kind: input, shape index: {}]   ;;  %s963_s5 = inlined_call_operand.hbm [shape: bf16[256,256], index: 5, kind: input, shape index: {}]   ;;  %s964_s6 = inlined_call_operand.vmem [shape: f32[1,256], index: 6, kind: input, shape index: {}]   ;;  %s965_s7 = inlined_call_operand.vmem [shape: f32[1,256], index: 7, kind: input, shape index: {}]   ;;  %s966_s8 = inlined_call_operand.<no memory space> [shape: f32[1,1], index: 8, kind: input, shape index: {}]   ;;  %s967_s9 = inlined_call_operand.vmem [shape: f32[8,1], index: 9, kind: output, shape index: {}]  }
   0x1   :  { %v14_v0 = vstv %s966_s8 }
   0x2   :  { %15 = vst [vmem:[#allocation2] sm:$0x1] %v14_v0 }
   0x3   :  { %16 = vsyncpa [#allocation4], 0 }
   0x4   :  { %17 = vsyncpa [#allocation6], 0 }
   0x5   :  { %18 = vsyncpa [#allocation9], 0  ;;  %s830_s11 = smov [#allocation5]   ;;  %s736_s15 = scalar_lea.hbm %s959_s1, 128 }
   0x6   :  { %s34_s12 = sshll.u32 %s830_s11, 4  ;;  %p737_p0 = scmp.ne.s32.totalorder %s959_s1, %s736_s15  ;;  %s35_s12 = int_to_ptr.vmem [resolvable:$true] %s34_s12 }
   0x7   :  { %p740_p1 = scmp.lt.u32.totalorder %s736_s15, %s959_s1 }
   0x9   :  { %p742_p2 = pnand %p740_p1, %p737_p0 }
   0xb   :  { %745 = shalt.err (!%p742_p2)
}
   0xc   :  { %s746_s8 = scalar_lea.vmem %s35_s12, 128  ;;  %p751_p4 = scmp.lt.s32.totalorder %s35_s12, %s35_s12 }
   0xd   :  { %p747_p3 = scmp.ne.s32.totalorder %s35_s12, %s746_s8  ;;  %p752_p5 = scmp.lt.s32.totalorder %s746_s8, %s746_s8 }
   0xf   :  { %p753_p6 = por %p752_p5, %p751_p4 }
  0x11   :  { %p754_p7 = pnand %p753_p6, %p747_p3 }
  0x13   :  { %757 = shalt.err (!%p754_p7)
}
  0x14   :  { %s831_s20 = smov 64   ;;  %s832_s21 = smov 4  }
  0x15   :  { %40 = dma.hbm_to_vmem [thread:$0]  %s959_s1, 128, %s35_s12, [#allocation6], %s831_s20, %s831_s20, %s832_s21  }
  0x16   :  { %s833_s24 = smov [#allocation3]   ;;  %s834_s26 = smov [#allocation7]  }
  0x17   :  { %s25_s25 = sshll.u32 %s833_s24, 4  ;;  %s48_s27 = sshll.u32 %s834_s26, 4  ;;  %s26_s25 = int_to_ptr.vmem [resolvable:$true] %s25_s25  ;;  %s49_s27 = int_to_ptr.vmem [resolvable:$true] %s48_s27 }
  0x18   :  { %s758_s30 = scalar_lea.hbm %s958_s0, 128 }
  0x19   :  { %p759_p8 = scmp.ne.s32.totalorder %s958_s0, %s758_s30  ;;  %p762_p9 = scmp.lt.u32.totalorder %s758_s30, %s958_s0 }
  0x1b   :  { %p764_p10 = pnand %p762_p9, %p759_p8 }
  0x1d   :  { %767 = shalt.err (!%p764_p10)
}
  0x1e   :  { %s768_s1 = scalar_lea.vmem %s26_s25, 128  ;;  %p773_p12 = scmp.lt.s32.totalorder %s26_s25, %s26_s25 }
  0x1f   :  { %p769_p11 = scmp.ne.s32.totalorder %s26_s25, %s768_s1  ;;  %p774_p13 = scmp.lt.s32.totalorder %s768_s1, %s768_s1 }
  0x21   :  { %p775_p0 = por %p774_p13, %p773_p12 }
  0x23   :  { %p776_p1 = pnand %p775_p0, %p769_p11 }
  0x25   :  { %779 = shalt.err (!%p776_p1)
}
  0x26   :  { %28 = dma.hbm_to_vmem [thread:$0]  %s958_s0, 128, %s26_s25, [#allocation4]  }
  0x27   :  { %s780_s18 = scalar_lea.hbm %s961_s3, 2048 }
  0x28   :  { %p781_p2 = scmp.ne.s32.totalorder %s961_s3, %s780_s18  ;;  %p784_p3 = scmp.lt.u32.totalorder %s780_s18, %s961_s3 }
  0x2a   :  { %p786_p4 = pnand %p784_p3, %p781_p2 }
  0x2c   :  { %789 = shalt.err (!%p786_p4)
}
  0x2d   :  { %s790_s22 = scalar_lea.vmem %s49_s27, 2048  ;;  %p795_p6 = scmp.lt.s32.totalorder %s49_s27, %s49_s27 }
  0x2e   :  { %p791_p5 = scmp.ne.s32.totalorder %s49_s27, %s790_s22  ;;  %p796_p7 = scmp.lt.s32.totalorder %s790_s22, %s790_s22 }
  0x30   :  { %p797_p8 = por %p796_p7, %p795_p6 }
  0x32   :  { %p798_p9 = pnand %p797_p8, %p791_p5 }
  0x34   :  { %801 = shalt.err (!%p798_p9)
}
  0x35   :  { %s835_s0 = smov 128   ;;  %s836_s23 = smov 8  }
  0x36   :  { %54 = dma.hbm_to_vmem [thread:$0]  %s961_s3, 2048, %s49_s27, [#allocation6], %s835_s0, %s835_s0, %s836_s23  }
  0x37   :  { %s837_s26 = smov [#allocation8]   ;;  %s802_s10 = scalar_lea.hbm %s963_s5, 4096 }
  0x38   :  { %s62_s28 = sshll.u32 %s837_s26, 4  ;;  %p803_p10 = scmp.ne.s32.totalorder %s963_s5, %s802_s10  ;;  %s63_s28 = int_to_ptr.vmem [resolvable:$true] %s62_s28 }
  0x39   :  { %p806_p11 = scmp.lt.u32.totalorder %s802_s10, %s963_s5 }
  0x3b   :  { %p808_p12 = pnand %p806_p11, %p803_p10 }
  0x3d   :  { %811 = shalt.err (!%p808_p12)
}
  0x3e   :  { %s812_s12 = scalar_lea.vmem %s63_s28, 4096  ;;  %p817_p0 = scmp.lt.s32.totalorder %s63_s28, %s63_s28 }
  0x3f   :  { %p813_p13 = scmp.ne.s32.totalorder %s63_s28, %s812_s12  ;;  %p818_p1 = scmp.lt.s32.totalorder %s812_s12, %s812_s12 }
  0x41   :  { %p819_p2 = por %p818_p1, %p817_p0 }
  0x43   :  { %p820_p3 = pnand %p819_p2, %p813_p13 }
  0x45   :  { %823 = shalt.err (!%p820_p3)
}
  0x46   :  { %68 = dma.hbm_to_vmem [thread:$0]  %s963_s5, 4096, %s63_s28, [#allocation9], %s835_s0, %s835_s0, %s836_s23  }
  0x47   :  { %824 = dma.done.wait [#allocation4], 128  }
  0x48   :  { %825 = vsyncadd [#allocation4], 4294967168 }
  0x49   :  { %826 = dma.done.wait [#allocation6], 2176  }
  0x4a   :  { %827 = vsyncadd [#allocation6], 4294965120 }
  0x4b   :  { %828 = dma.done.wait [#allocation9], 4096  }
  0x4c   :  { %829 = vsyncadd [#allocation9], 4294963200  ;;  %vm108_vm0 = vcmask 1044480   ;;  %v838_v1 = vmov 0.0   ;;  %vm839_vm1 = vmmov 0   ;;  %vm109_vm2 = vcmask 1045504  }
  0x4d   :  { %645 = vmatprep.subr.bf16.mxu1 %v838_v1  ;;  %647 = vmatprep.mubr.msk.bf16.mxu1 %vm839_vm1, %v838_v1  ;;  %v840_v2 = vmov 65535   ;;  %v663_v5 = vld [vmem:[#allocation5] sm:$0x3f]   ;;  %v88_v6 = vld [vmem:[#allocation3] sm:$0xff]  ;;  %v666_v8 = vld [vmem:[#allocation7 + $0x4] ss:$8 sps:$4 sm:$0xff]  }
  0x4e   :  { %v110_v3 = vsel %vm108_vm0, 4294967295, %v840_v2  ;;  %v89_v9 = vpack.c.bf16 %v88_v6, %v88_v6  ;;  %vm104_vm3 = vcmask 89088   ;;  %v664_v10 = vld [vmem:[#allocation7] ss:$8 sps:$4 sm:$0xff]   ;;  %v669_v11 = vld [vmem:[#allocation7 + $0x14] ss:$8 sps:$4 sm:$0xff]   ;;  %v175_v2 = vlaneseq }
  0x4f   :  { %v111_v4 = vsel %vm109_vm2, %v110_v3, 0  ;;  %v667_v12 = vld [vmem:[#allocation7 + $0x10] ss:$8 sps:$4 sm:$0xff]   ;;  %v672_v13 = vld [vmem:[#allocation7 + $0x24] ss:$8 sps:$4 sm:$0xff]   ;;  %v841_v25 = vmov 0  }
  0x50   :  { %v113_v7 = vand.u32 %v663_v5, %v111_v4  ;;  %v670_v14 = vld [vmem:[#allocation7 + $0x20] ss:$8 sps:$4 sm:$0xff]   ;;  %v675_v15 = vld [vmem:[#allocation7 + $0x34] ss:$8 sps:$4 sm:$0xff]   ;;  %v673_v16 = vld [vmem:[#allocation7 + $0x30] ss:$8 sps:$4 sm:$0xff]  }
  0x51   :  { %v678_v17 = vld [vmem:[#allocation7 + $0x44] ss:$8 sps:$4 sm:$0xff]   ;;  %v676_v18 = vld [vmem:[#allocation7 + $0x40] ss:$8 sps:$4 sm:$0xff]   ;;  %v681_v19 = vld [vmem:[#allocation7 + $0x54] ss:$8 sps:$4 sm:$0xff]  }
  0x52   :  { %646 = vmatpush3.bf16.msra.mxu1 %v113_v7  ;;  %v679_v20 = vld [vmem:[#allocation7 + $0x50] ss:$8 sps:$4 sm:$0xff]   ;;  %v684_v21 = vld [vmem:[#allocation7 + $0x64] ss:$8 sps:$4 sm:$0xff]   ;;  %v682_v22 = vld [vmem:[#allocation7 + $0x60] ss:$8 sps:$4 sm:$0xff]  }
  0x53   :  { %265 = vmatprep.subr.bf16.mxu1 %v666_v8  ;;  %v687_v23 = vld [vmem:[#allocation7 + $0x74] ss:$8 sps:$4 sm:$0xff]   ;;  %v685_v24 = vld [vmem:[#allocation7 + $0x70] ss:$8 sps:$4 sm:$0xff]   ;;  %v688_v26 = vld [vmem:[#allocation8 + $0x4] ss:$8 sps:$4 sm:$0xff]  }
  0x54   :  { %v690_v27 = vld [vmem:[#allocation8] ss:$8 sps:$4 sm:$0xff]   ;;  %v691_v28 = vld [vmem:[#allocation8 + $0x14] ss:$8 sps:$4 sm:$0xff]   ;;  %514 = vmatprep.subr.bf16.mxu0 %v688_v26  ;;  %v693_v29 = vld [vmem:[#allocation8 + $0x10] ss:$8 sps:$4 sm:$0xff]  }
  0x55   :  { %648 = vmatmul.mubr.msk.bf16.vlgmr.msra.gmra.mrb[0].mxu1 %vm104_vm3, %v89_v9  ;;  %515 = vmatpush1.bf16.msra.mxu0 %v690_v27  ;;  %v694_v30 = vld [vmem:[#allocation8 + $0x24] ss:$8 sps:$4 sm:$0xff]   ;;  %v696_v31 = vld [vmem:[#allocation8 + $0x20] ss:$8 sps:$4 sm:$0xff]   ;;  %v697_v32 = vld [vmem:[#allocation8 + $0x34] ss:$8 sps:$4 sm:$0xff]  }
  0x56   :  { %266 = vmatpush1.bf16.msra.mxu1 %v664_v10  ;;  %297 = vmatprep.mubr.bf16.mxu1 %v841_v25  ;;  %v699_v33 = vld [vmem:[#allocation8 + $0x30] ss:$8 sps:$4 sm:$0xff]   ;;  %v700_v34 = vld [vmem:[#allocation8 + $0x44] ss:$8 sps:$4 sm:$0xff]   ;;  %v702_v35 = vld [vmem:[#allocation8 + $0x40] ss:$8 sps:$4 sm:$0xff]  }
  0x57   :  { %267 = vmatprep.subr.bf16.mxu1 %v669_v11  ;;  %516 = vmatprep.subr.bf16.mxu0 %v691_v28  ;;  %v703_v36 = vld [vmem:[#allocation8 + $0x54] ss:$8 sps:$4 sm:$0xff]   ;;  %v705_v37 = vld [vmem:[#allocation8 + $0x50] ss:$8 sps:$4 sm:$0xff]   ;;  %v706_v38 = vld [vmem:[#allocation8 + $0x64] ss:$8 sps:$4 sm:$0xff]  }
  0x58   :  { %v708_v39 = vld [vmem:[#allocation8 + $0x60] ss:$8 sps:$4 sm:$0xff]   ;;  %v709_v40 = vld [vmem:[#allocation8 + $0x74] ss:$8 sps:$4 sm:$0xff]   ;;  %v711_v41 = vld [vmem:[#allocation8 + $0x70] ss:$8 sps:$4 sm:$0xff]  }
  0x59   :  { %517 = vmatpush1.bf16.msra.mxu0 %v693_v29  ;;  %v712_v42 = vld [vmem:[#allocation8 + $0x84] ss:$8 sps:$4 sm:$0xff]   ;;  %v714_v43 = vld [vmem:[#allocation8 + $0x80] ss:$8 sps:$4 sm:$0xff]   ;;  %v715_v44 = vld [vmem:[#allocation8 + $0x94] ss:$8 sps:$4 sm:$0xff]  }
  0x5a   :  { %268 = vmatpush1.bf16.msra.mxu1 %v667_v12  ;;  %518 = vmatprep.subr.bf16.mxu0 %v694_v30  ;;  %v717_v45 = vld [vmem:[#allocation8 + $0x90] ss:$8 sps:$4 sm:$0xff]   ;;  %v718_v46 = vld [vmem:[#allocation8 + $0xa4] ss:$8 sps:$4 sm:$0xff]   ;;  %v720_v47 = vld [vmem:[#allocation8 + $0xa0] ss:$8 sps:$4 sm:$0xff]  }
  0x5b   :  { %269 = vmatprep.subr.bf16.mxu1 %v672_v13  ;;  %v721_v48 = vld [vmem:[#allocation8 + $0xb4] ss:$8 sps:$4 sm:$0xff]   ;;  %v723_v49 = vld [vmem:[#allocation8 + $0xb0] ss:$8 sps:$4 sm:$0xff]   ;;  %v724_v50 = vld [vmem:[#allocation8 + $0xc4] ss:$8 sps:$4 sm:$0xff]  }
  0x5c   :  { %v726_v51 = vld [vmem:[#allocation8 + $0xc0] ss:$8 sps:$4 sm:$0xff]   ;;  %v727_v52 = vld [vmem:[#allocation8 + $0xd4] ss:$8 sps:$4 sm:$0xff]   ;;  %v729_v53 = vld [vmem:[#allocation8 + $0xd0] ss:$8 sps:$4 sm:$0xff]  }
  0x5d   :  { %519 = vmatpush1.bf16.msra.mxu0 %v696_v31  ;;  %v591_v54 = vld [vmem:[%s960_s2] ss:$0 sm:$0xff]  ;;  %v732_v63 = vld [vmem:[#allocation8 + $0xe0] ss:$8 sps:$4 sm:$0xff]   ;;  %v733_v0 = vld [vmem:[#allocation8 + $0xf4] ss:$8 sps:$4 sm:$0xff]  }
  0x5e   :  { %270 = vmatpush1.bf16.msra.mxu1 %v670_v14  ;;  %520 = vmatprep.subr.bf16.mxu0 %v697_v32  ;;  %v730_v62 = vld [vmem:[#allocation8 + $0xe4] ss:$8 sps:$4 sm:$0xff]   ;;  %v735_v1 = vld [vmem:[#allocation8 + $0xf0] ss:$8 sps:$4 sm:$0xff]   ;;  %v176_v3 = vshrl.u32 %v175_v2, 7  ;;  %vm582_vm4 = vcmask 7168  }
  0x5f   :  { %271 = vmatprep.subr.bf16.mxu1 %v675_v15  ;;  %v173_v5 = vld [vmem:[%s962_s4] sm:$0x3] }
  0x60   :  { %v177_v4 = vsub.s32 0, %v176_v3  ;;  %v181_v6 = vsub.s32 1, %v176_v3 }
  0x61   :  { %521 = vmatpush1.bf16.msra.mxu0 %v699_v33 }
  0x62   :  { %272 = vmatpush1.bf16.msra.mxu1 %v673_v16  ;;  %522 = vmatprep.subr.bf16.mxu0 %v700_v34  ;;  %v178_v7 = vrot.slane %v173_v5, %v177_v4  ;;  %v182_v8 = vrot.slane %v173_v5, %v181_v6 }
  0x63   :  { %273 = vmatprep.subr.bf16.mxu1 %v678_v17 }
  0x65   :  { %523 = vmatpush1.bf16.msra.mxu0 %v702_v35 }
  0x66   :  { %274 = vmatpush1.bf16.msra.mxu1 %v676_v18  ;;  %524 = vmatprep.subr.bf16.mxu0 %v703_v36  ;;  %v642_v36 = vld [vmem:[#allocation2] ss:$0 sm:$0xff] }
  0x67   :  { %275 = vmatprep.subr.bf16.mxu1 %v681_v19  ;;  %v342_v19 = vld [vmem:[%s964_s6] sm:$0x3] }
  0x69   :  { %525 = vmatpush1.bf16.msra.mxu0 %v705_v37 }
  0x6a   :  { %276 = vmatpush1.bf16.msra.mxu1 %v679_v20  ;;  %526 = vmatprep.subr.bf16.mxu0 %v706_v38  ;;  %v347_v20 = vrot.slane %v342_v19, %v177_v4 }
  0x6b   :  { %277 = vmatprep.subr.bf16.mxu1 %v684_v21  ;;  %v351_v21 = vrot.slane %v342_v19, %v181_v6 }
  0x6d   :  { %527 = vmatpush1.bf16.msra.mxu0 %v708_v39 }
  0x6e   :  { %278 = vmatpush1.bf16.msra.mxu1 %v682_v22  ;;  %528 = vmatprep.subr.bf16.mxu0 %v709_v40  ;;  %v557_v22 = vld [vmem:[%s965_s7] sm:$0x3] }
  0x6f   :  { %279 = vmatprep.subr.bf16.mxu1 %v687_v23  ;;  %v562_v26 = vrot.slane %v557_v22, %v177_v4  ;;  %v566_v29 = vrot.slane %v557_v22, %v181_v6 }
  0x71   :  { %529 = vmatpush1.bf16.msra.mxu0 %v711_v41 }
  0x72   :  { %280 = vmatpush1.bf16.msra.mxu1 %v685_v24  ;;  %530 = vmatprep.subr.bf16.mxu0 %v712_v42 }
  0x75   :  { %531 = vmatpush1.bf16.msra.mxu0 %v714_v43 }
  0x76   :  { %532 = vmatprep.subr.bf16.mxu0 %v715_v44 }
  0x79   :  { %533 = vmatpush1.bf16.msra.mxu0 %v717_v45 }
  0x7a   :  { %534 = vmatprep.subr.bf16.mxu0 %v718_v46 }
  0x7d   :  { %535 = vmatpush1.bf16.msra.mxu0 %v720_v47 }
  0x7e   :  { %536 = vmatprep.subr.bf16.mxu0 %v721_v48 }
  0x81   :  { %537 = vmatpush1.bf16.msra.mxu0 %v723_v49 }
  0x82   :  { %538 = vmatprep.subr.bf16.mxu0 %v724_v50 }
  0x85   :  { %539 = vmatpush1.bf16.msra.mxu0 %v726_v51 }
  0x86   :  { %540 = vmatprep.subr.bf16.mxu0 %v727_v52 }
  0x89   :  { %541 = vmatpush1.bf16.msra.mxu0 %v729_v53 }
  0x8a   :  { %542 = vmatprep.subr.bf16.mxu0 %v730_v62 }
  0x8d   :  { %543 = vmatpush1.bf16.msra.mxu0 %v732_v63 }
  0x8e   :  { %544 = vmatprep.subr.bf16.mxu0 %v733_v0 }
  0x91   :  { %545 = vmatpush1.bf16.msra.mxu0 %v735_v1 }
 0x128   :  { %v149_v55 = vpop.f32.mrb[0].mxu1 }
 0x129   :  { %v150_v56 = vadd.f32 %v591_v54, %v149_v55  ;;  %v649_v57 = vpop.f32.mrb[1].mxu1 }
 0x12a   :  { %v152_v58 = vpop.f32.mrb[2].mxu1 }
 0x12b   :  { %v155_v59 = vmax.f32 %v150_v56, 0.0  ;;  %v650_v60 = vpop.f32.mrb[3].mxu1 }
 0x12d   :  { %v156_v61 = vpack.c.bf16 %v155_v59, %v155_v59 }
 0x12f   :  { %298 = vmatmul.mubr.bf16.vlgmr.msra.gmra.mrb[4].mxu1 %v156_v61 }
 0x202   :  { %v299_v9 = vpop.f32.mrb[4].mxu1 }
 0x203   :  { %v300_v10 = vadd.f32 %v299_v9, %v178_v7  ;;  %v301_v11 = vpop.f32.mrb[5].mxu1 }
 0x204   :  { %v302_v12 = vadd.f32 %v301_v11, %v182_v8  ;;  %v303_v13 = vpop.f32.mrb[6].mxu1 }
 0x205   :  { %v306_v14 = vmax.f32 %v300_v10, 0.0  ;;  %v304_v15 = vpop.f32.mrb[7].mxu1 }
 0x206   :  { %v307_v16 = vmax.f32 %v302_v12, 0.0 }
 0x207   :  { %v308_v18 = vpack.c.bf16 %v306_v14, %v306_v14 }
 0x208   :  { %v309_v17 = vpack.c.bf16 %v307_v16, %v307_v16 }
 0x20a   :  { %546 = vmatprep.mubr.bf16.mxu0 %v309_v17 }
 0x20b   :  { %547 = vmatmul.mubr.bf16.vlgmr.msra.gmra.mrb[0].mxu0 %v308_v18 }
 0x2de   :  { %v548_v23 = vpop.f32.mrb[0].mxu0 }
 0x2df   :  { %v549_v24 = vadd.f32 %v548_v23, %v347_v20  ;;  %v550_v25 = vpop.f32.mrb[1].mxu0 }
 0x2e0   :  { %v551_v27 = vadd.f32 %v550_v25, %v351_v21  ;;  %v552_v28 = vpop.f32.mrb[2].mxu0 }
 0x2e1   :  { %v555_v30 = vmax.f32 %v549_v24, 0.0  ;;  %v553_v31 = vpop.f32.mrb[3].mxu0 }
 0x2e2   :  { %v556_v32 = vmax.f32 %v551_v27, 0.0 }
 0x2e3   :  { %v569_v33 = vmul.f32 %v562_v26, %v555_v30 }
 0x2e4   :  { %v570_v34 = vmul.f32 %v566_v29, %v556_v32 }
 0x2e6   :  { %v571_v35 = vadd.f32 %v570_v34, %v569_v33 }
 0x2e8   :  { %572 = vadd.xlane.f32.xlu0 %v571_v35 }
 0x375   :  { %v573_v37 = vpop.xlane.xlu0 %572 }
 0x376   :  { %v581_v38 = vadd.f32 %v642_v36, %v573_v37 }
 0x378   :  { %583 = vst.msk [vmem:[%s967_s9] sm:$0xff] %vm582_vm4, %v581_v38 }
 0x379   :  { %588 = vsyncpa [#allocation4], 1 }
 0x37a   :  { %589 = vsyncpa [#allocation6], 1 }
 0x37b   :  { %590 = vsyncpa [#allocation9], 1 }

</bundles_post_ra>
